<compile_context>
chip_gen: v6e
topology: v6e:2x2x1
jax: 0.10.0
libtpu: 0.0.40
codegen_flags: <defaults>
</compile_context>

<pallas_src>
import jax
import jax.numpy as jnp
from jax import lax
from jax.experimental import pallas as pl
from jax.experimental.pallas import tpu as pltpu

_MiB = 1024 * 1024


# ---------------------------------------------------------------------------
# Kernels
# ---------------------------------------------------------------------------
def _bmm_nn_kernel(a_ref, b_ref, o_ref):
    """K unsplit: a_ref (Rb, tm, K) @ b_ref (Rb, K, tn) -> o_ref (Rb, tm, tn)."""
    o_ref[...] = lax.dot_general(
        a_ref[...], b_ref[...],
        dimension_numbers=(((2,), (1,)), ((0,), (0,))),     # batched NN
        preferred_element_type=jnp.float32,
    ).astype(o_ref.dtype)


def _bmm_nn_ksplit_kernel(a_ref, b_ref, o_ref, acc_ref):
    """K split along grid axis 3; f32 accumulator resident across k steps."""
    k = pl.program_id(3)
    partial = lax.dot_general(
        a_ref[...], b_ref[...],
        dimension_numbers=(((2,), (1,)), ((0,), (0,))),
        preferred_element_type=jnp.float32,
    )

    @pl.when(k == 0)
    def _():
        acc_ref[...] = partial            # direct assign; no zero-init + add

    @pl.when(k > 0)
    def _():
        acc_ref[...] += partial

    @pl.when(k == pl.num_programs(3) - 1)
    def _():
        o_ref[...] = acc_ref[...].astype(o_ref.dtype)


# ---------------------------------------------------------------------------
# Shape-adaptive, VMEM-budgeted tile selection
# ---------------------------------------------------------------------------
def _largest_divisor(dim, candidates):
    for c in candidates:
        if c <= dim and dim % c == 0:
            return c
    return dim  # full extent is always layout-legal


def _hw_info():
    """Returns (tile VMEM budget in bytes, min #grid-steps along R)."""
    try:
        cap = int(pltpu.get_tpu_info().vmem_capacity_bytes)
    except Exception:
        cap = 128 * _MiB
    budget = min(cap // 4, 24 * _MiB)     # headroom for Pallas internal scratch
    try:
        kind = (jax.devices()[0].device_kind or "").lower()
    except Exception:
        kind = ""
    # Megacore parts (2 TensorCores per device) want >= 2 steps on the
    # "parallel" R axis; single-TC parts collapse R into one step.
    min_r_steps = 2 if ("v7" in kind or "v4" in kind) else 1
    return budget, min_r_steps


def _pick_tiles(M, N, K, itemsize, budget_bytes):
    # bf16 / 8-bit pack rows along sublanes -> keep tm a multiple of 16.
    tm_cands = (512, 256, 128, 64, 32, 16) if itemsize < 4 else (512, 256, 128, 64, 32, 16, 8)
    tm = _largest_divisor(M, tm_cands)
    tn = _largest_divisor(N, (512, 256, 128))

    def per_repeat_bytes(tk, with_acc):
        buf = 2 * (tm * tk + tk * tn + tm * tn) * itemsize   # double-buffered tiles
        if with_acc:
            buf += tm * tn * 4
        return buf

    # Prefer K unsplit: single MXU pass, no accumulator scratch.
    if per_repeat_bytes(K, with_acc=False) <= budget_bytes:
        return tm, tn, K
    for cand in (2048, 1024, 512, 256, 128):
        if cand < K and K % cand == 0 and per_repeat_bytes(cand, True) <= budget_bytes:
            return tm, tn, cand
    # Last resort: smallest 128-multiple divisor of K (best-effort on budget).
    for cand in (128, 256, 512, 1024, 2048):
        if cand < K and K % cand == 0:
            return tm, tn, cand
    return tm, tn, K


def _pick_rb(R, per_repeat_bytes, budget_bytes, min_steps):
    """Largest Rb dividing R that keeps >= min_steps grid steps and fits VMEM."""
    for rb in range(R, 0, -1):
        if R % rb:
            continue
        if (R // rb) < min_steps and rb > 1:
            continue
        if rb * per_repeat_bytes <= budget_bytes:
            return rb
    return 1


# ---------------------------------------------------------------------------
# Batched wrapper: out[r] = a[r] @ b[r]   (b already pre-transposed to (K, N))
# ---------------------------------------------------------------------------
@jax.jit
def bmm_nn(a, b):
    """a: (R, M, K), b: (R, K, N)  ->  (R, M, N) in a.dtype (f32 MXU accumulate)."""
    R, M, K = a.shape
    Rb_, Kb, N = b.shape
    assert R == Rb_ and K == Kb, "batch / contraction dims must match"

    itemsize = jnp.dtype(a.dtype).itemsize
    budget, min_r_steps = _hw_info()
    tm, tn, tk = _pick_tiles(M, N, K, itemsize, budget)
    ksplit = tk < K

    per_rep = 2 * (tm * tk + tk * tn + tm * tn) * itemsize + (tm * tn * 4 if ksplit else 0)
    rb = _pick_rb(R, per_rep, budget, min_r_steps)

    cost = pl.CostEstimate(
        flops=2 * R * M * N * K,
        transcendentals=0,
        bytes_accessed=itemsize * R * (M * K + K * N + M * N),
    )
    vmem_limit = int(min(32 * _MiB, max(16 * _MiB, 2 * rb * per_rep + 4 * _MiB)))
    cparams = pltpu.CompilerParams(
        dimension_semantics=("parallel", "parallel", "parallel") + (("arbitrary",) if ksplit else ()),
        vmem_limit_bytes=vmem_limit,
    )

    if not ksplit:
        grid = (R // rb, M // tm, N // tn)
        grid_spec = pltpu.PrefetchScalarGridSpec(
            num_scalar_prefetch=0,
            grid=grid,
            in_specs=[
                pl.BlockSpec((rb, tm, K), lambda r, i, j: (r, i, 0)),   # A
                pl.BlockSpec((rb, K, tn), lambda r, i, j: (r, 0, j)),   # B (pre-transposed)
            ],
            out_specs=pl.BlockSpec((rb, tm, tn), lambda r, i, j: (r, i, j)),
        )
        kernel = _bmm_nn_kernel
    else:
        grid = (R // rb, M // tm, N // tn, K // tk)
        grid_spec = pltpu.PrefetchScalarGridSpec(
            num_scalar_prefetch=0,
            grid=grid,
            in_specs=[
                pl.BlockSpec((rb, tm, tk), lambda r, i, j, k: (r, i, k)),
                pl.BlockSpec((rb, tk, tn), lambda r, i, j, k: (r, k, j)),
            ],
            out_specs=pl.BlockSpec((rb, tm, tn), lambda r, i, j, k: (r, i, j)),
            scratch_shapes=[pltpu.VMEM((rb, tm, tn), jnp.float32)],
        )
        kernel = _bmm_nn_ksplit_kernel

    return pl.pallas_call(
        kernel,
        out_shape=jax.ShapeDtypeStruct((R, M, N), a.dtype),
        grid_spec=grid_spec,
        compiler_params=cparams,
        cost_estimate=cost,
    )(a, b)


# ---------------------------------------------------------------------------
# Module port
# ---------------------------------------------------------------------------
class MM:
    """JAX/Pallas port of the PyTorch MM module: R small GEMMs, one fused call."""

    def __init__(self, m: int, k: int, n: int, dtype=jnp.bfloat16, repeats: int = 1,
                 key=None):
        if key is None:
            key = jax.random.PRNGKey(0)
        keys = jax.random.split(key, 2 * repeats)
        # Deterministic synthetic "randn" parameters (module __init__ uses randn).
        self.m1s = [jax.random.normal(keys[2 * i], (m, k), dtype=jnp.float32).astype(dtype)
                    for i in range(repeats)]
        self.m2s = [jax.random.normal(keys[2 * i + 1], (n, k), dtype=jnp.float32).astype(dtype)
                    for i in range(repeats)]
        # One-time layout prep so the forward pass is a single fused pallas_call:
        #   A stacked (R, m, k); B stacked AND pre-transposed to (R, k, n) so the
        #   kernel runs a plain NN contraction (no per-step XLU transpose).
        self._a = jnp.stack(self.m1s)                       # (R, m, k)
        self._b = jnp.stack(self.m2s).transpose(0, 2, 1)    # (R, k, n)

    def __call__(self):
        out = bmm_nn(self._a, self._b)                      # (R, m, n) — one kernel
        return [out[i] for i in range(out.shape[0])]        # match module's list output


if __name__ == "__main__":
    # Small shapes consistent with the module; multiples of the (8, 128) tile.
    m, k, n, repeats = 128, 256, 128, 4

    model = MM(m=m, k=k, n=n, dtype=jnp.bfloat16, repeats=repeats,
               key=jax.random.PRNGKey(0))
    outs = model()
    outs = jax.block_until_ready(outs)

    # Correctness check vs. plain JAX reference (f32 reference, bf16 tolerance).
    for m1, m2, out in zip(model.m1s, model.m2s, outs):
        ref = jnp.dot(m1.astype(jnp.float32), m2.astype(jnp.float32).T)
        assert out.shape == (m, n) and out.dtype == jnp.bfloat16
        err = float(jnp.max(jnp.abs(out.astype(jnp.float32) - ref)))
        scale = float(jnp.max(jnp.abs(ref))) + 1e-6
        assert err < 1.0 and err / scale < 0.02, f"error too large: abs={err}, rel={err/scale}"

    print("KERNEL_OK")
</pallas_src>

<mosaic_0001>
module attributes {stable_mosaic.version = 11 : i64} {
  func.func @_bmm_nn_kernel(%arg0: i32, %arg1: i32, %arg2: i32, %arg3: memref<4x128x256xbf16, #tpu.memory_space<vmem>>, %arg4: memref<4x256x128xbf16, #tpu.memory_space<vmem>>, %arg5: memref<4x128x128xbf16, #tpu.memory_space<vmem>>) attributes {dimension_semantics = [#tpu.dimension_semantics<parallel>, #tpu.dimension_semantics<parallel>, #tpu.dimension_semantics<parallel>], iteration_bounds = array<i64: 1, 1, 1>, scalar_prefetch = 0 : i64, scratch_operands = 0 : i64, tpu.core_type = #tpu.core_type<tc>, window_params = [{transform_indices = @transform_0, window_bounds = array<i64: 4, 128, 256>}, {transform_indices = @transform_1, window_bounds = array<i64: 4, 256, 128>}, {transform_indices = @transform_2, window_bounds = array<i64: 4, 128, 128>}]} {
    %c0 = arith.constant 0 : index
    %c0_0 = arith.constant 0 : index
    %c0_1 = arith.constant 0 : index
    %0 = vector.load %arg3[%c0, %c0_0, %c0_1] : memref<4x128x256xbf16, #tpu.memory_space<vmem>>, vector<4x128x256xbf16>
    %c0_2 = arith.constant 0 : index
    %c0_3 = arith.constant 0 : index
    %c0_4 = arith.constant 0 : index
    %1 = vector.load %arg4[%c0_2, %c0_3, %c0_4] : memref<4x256x128xbf16, #tpu.memory_space<vmem>>, vector<4x256x128xbf16>
    %cst = arith.constant dense<0.000000e+00> : vector<4x128x128xf32>
    %2 = tpu.matmul %0, %1, %cst {dimension_numbers = #tpu.dot_dimension_numbers<[2], [1], [1], [2], [0, 0, 0, 1, 1, 2], [0], [0]>} : vector<4x128x256xbf16>, vector<4x256x128xbf16>, vector<4x128x128xf32> -> vector<4x128x128xf32>
    %3 = arith.truncf %2 : vector<4x128x128xf32> to vector<4x128x128xbf16>
    %c0_5 = arith.constant 0 : index
    %c0_6 = arith.constant 0 : index
    %c0_7 = arith.constant 0 : index
    %4 = vector.load %arg5[%c0_5, %c0_6, %c0_7] : memref<4x128x128xbf16, #tpu.memory_space<vmem>>, vector<4x128x128xbf16>
    tpu.vector_store %arg5[%c0_5, %c0_6, %c0_7], %3 {strides = array<i32>} : memref<4x128x128xbf16, #tpu.memory_space<vmem>>, vector<4x128x128xbf16>,
    return
  }
  func.func @transform_0(%arg0: i32, %arg1: i32, %arg2: i32) -> (i32, i32, i32) {
    %c0_i32 = arith.constant 0 : i32
    %c0_i32_0 = arith.constant 0 : i32
    return %arg0, %arg1, %c0_i32 : i32, i32, i32
  }
  func.func @transform_1(%arg0: i32, %arg1: i32, %arg2: i32) -> (i32, i32, i32) {
    %c0_i32 = arith.constant 0 : i32
    %c0_i32_0 = arith.constant 0 : i32
    return %arg0, %c0_i32, %arg2 : i32, i32, i32
  }
  func.func @transform_2(%arg0: i32, %arg1: i32, %arg2: i32) -> (i32, i32, i32) {
    %c0_i32 = arith.constant 0 : i32
    return %arg0, %arg1, %arg2 : i32, i32, i32
  }
}

</mosaic_0001>

<bundles_post_ra>
// kernel: bmm_nn.1
= control target key start
LH: loop header
LB: loop body
LE: loop exit
PB: predicated region body
PF: predicated region fallthrough
CT: control target
= control target key end

     0   :  { %7 = vsyncpa [#allocation3], 0  ;;  %s2636_s0 = inlined_call_operand.hbm [shape: bf16[4,128,256], index: 0, kind: input, shape index: {}]   ;;  %s2637_s1 = inlined_call_operand.hbm [shape: bf16[4,256,128], index: 1, kind: input, shape index: {}]   ;;  %s2638_s2 = inlined_call_operand.hbm [shape: bf16[4,128,128], index: 2, kind: output, shape index: {}]  }
   0x1   :  { %8 = vsyncpa [#allocation6], 0 }
   0x2   :  { %9 = vsyncpa [#allocation4], 0  ;;  %s2599_s9 = smov [#allocation2]  }
   0x3   :  { %s15_s10 = sshll.u32 %s2599_s9, 4  ;;  %s16_s10 = int_to_ptr.vmem [resolvable:$true] %s15_s10 }
   0x4   :  { %s2541_s11 = scalar_lea.vmem %s16_s10, 8192  ;;  %p2546_p1 = scmp.lt.s32.totalorder %s16_s10, %s16_s10 }
   0x5   :  { %p2542_p0 = scmp.ne.s32.totalorder %s16_s10, %s2541_s11  ;;  %p2547_p2 = scmp.lt.s32.totalorder %s2541_s11, %s2541_s11 }
   0x7   :  { %p2548_p3 = por %p2547_p2, %p2546_p1 }
   0x9   :  { %p2549_p4 = pnand %p2548_p3, %p2542_p0 }
   0xb   :  { %2552 = shalt.err (!%p2549_p4)
}
   0xc   :  { %s2600_s12 = smov 128   ;;  %s2601_s13 = smov 8  }
   0xd   :  { %21 = dma.hbm_to_vmem [thread:$0]  %s2636_s0, 8192, %s16_s10, [#allocation3], %s2600_s12, %s2600_s12, %s2601_s13  }
   0xe   :  { %s2602_s16 = smov [#allocation5]  }
   0xf   :  { %s27_s17 = sshll.u32 %s2602_s16, 4  ;;  %s28_s17 = int_to_ptr.vmem [resolvable:$true] %s27_s17 }
  0x10   :  { %s2561_s18 = scalar_lea.vmem %s28_s17, 8192  ;;  %p2566_p6 = scmp.lt.s32.totalorder %s28_s17, %s28_s17 }
  0x11   :  { %p2562_p5 = scmp.ne.s32.totalorder %s28_s17, %s2561_s18  ;;  %p2567_p7 = scmp.lt.s32.totalorder %s2561_s18, %s2561_s18 }
  0x13   :  { %p2568_p8 = por %p2567_p7, %p2566_p6 }
  0x15   :  { %p2569_p9 = pnand %p2568_p8, %p2562_p5 }
  0x17   :  { %2572 = shalt.err (!%p2569_p9)
}
  0x18   :  { %s2603_s19 = smov 64   ;;  %s2604_s20 = smov 4  }
  0x19   :  { %33 = dma.hbm_to_vmem [thread:$0]  %s2637_s1, 8192, %s28_s17, [#allocation6], %s2603_s19, %s2603_s19, %s2604_s20  }
  0x1a   :  { %2593 = dma.done.wait [#allocation3], 8192  }
  0x1b   :  { %2594 = vsyncadd [#allocation3], 4294959104 }
  0x1c   :  { %2595 = dma.done.wait [#allocation6], 8192  }
  0x1d   :  { %2596 = vsyncadd [#allocation6], 4294959104  ;;  %v2373_v0 = vld [vmem:[#allocation5 + $0x78] sm:$0xff]   ;;  %v2377_v4 = vld [vmem:[#allocation5 + $0x70] sm:$0xff]   ;;  %s2605_s0 = smov [#allocation7]  }
  0x1e   :  { %v2374_v1 = vld [vmem:[#allocation5 + $0xf8] sm:$0xff]   ;;  %2110 = vmatprep.subr.bf16.mxu0 %v2373_v0  ;;  %v2378_v5 = vld [vmem:[#allocation5 + $0xf0] sm:$0xff]   ;;  %v2381_v8 = vld [vmem:[#allocation5 + $0x68] sm:$0xff]   ;;  %s1650_s1 = sshll.u32 %s2605_s0, 4  ;;  %s1651_s1 = int_to_ptr.vmem [resolvable:$true] %s1650_s1 }
  0x1f   :  { %v2375_v2 = vld [vmem:[#allocation5 + $0x38] sm:$0xff]   ;;  %2174 = vmatprep.subr.bf16.mxu1 %v2374_v1  ;;  %v2379_v6 = vld [vmem:[#allocation5 + $0x30] sm:$0xff]   ;;  %v2382_v9 = vld [vmem:[#allocation5 + $0xe8] sm:$0xff]   ;;  %s2573_s23 = scalar_lea.vmem %s1651_s1, 4096  ;;  %p2578_p11 = scmp.lt.s32.totalorder %s1651_s1, %s1651_s1 }
  0x20   :  { %v2376_v3 = vld [vmem:[#allocation5 + $0xb8] sm:$0xff]   ;;  %2111 = vmatpush3.bf16.msra.mxu0 %v2375_v2  ;;  %v2380_v7 = vld [vmem:[#allocation5 + $0xb0] sm:$0xff]   ;;  %v2383_v10 = vld [vmem:[#allocation5 + $0x28] sm:$0xff]   ;;  %p2574_p10 = scmp.ne.s32.totalorder %s1651_s1, %s2573_s23  ;;  %p2579_p12 = scmp.lt.s32.totalorder %s2573_s23, %s2573_s23 }
  0x21   :  { %2175 = vmatpush3.bf16.msra.mxu1 %v2376_v3  ;;  %2112 = vmatprep.subr.bf16.mxu0 %v2377_v4  ;;  %v2384_v11 = vld [vmem:[#allocation5 + $0xa8] sm:$0xff]   ;;  %v2385_v12 = vld [vmem:[#allocation5 + $0x60] sm:$0xff]   ;;  %v2389_v16 = vld [vmem:[#allocation5 + $0x58] sm:$0xff]  }
  0x22   :  { %2176 = vmatprep.subr.bf16.mxu1 %v2378_v5  ;;  %v2386_v13 = vld [vmem:[#allocation5 + $0xe0] sm:$0xff]   ;;  %v2390_v17 = vld [vmem:[#allocation5 + $0xd8] sm:$0xff]   ;;  %v2393_v20 = vld [vmem:[#allocation5 + $0x50] sm:$0xff]   ;;  %p2580_p13 = por %p2579_p12, %p2578_p11 }
  0x23   :  { %v2387_v14 = vld [vmem:[#allocation5 + $0x20] sm:$0xff]   ;;  %v2391_v18 = vld [vmem:[#allocation5 + $0x18] sm:$0xff]   ;;  %v2394_v21 = vld [vmem:[#allocation5 + $0xd0] sm:$0xff]  }
  0x24   :  { %2113 = vmatpush3.bf16.msra.mxu0 %v2379_v6  ;;  %v2388_v15 = vld [vmem:[#allocation5 + $0xa0] sm:$0xff]   ;;  %v2392_v19 = vld [vmem:[#allocation5 + $0x98] sm:$0xff]   ;;  %v2395_v22 = vld [vmem:[#allocation5 + $0x10] sm:$0xff]   ;;  %p2581_p0 = pnand %p2580_p13, %p2574_p10 }
  0x25   :  { %2177 = vmatpush3.bf16.msra.mxu1 %v2380_v7  ;;  %2114 = vmatprep.subr.bf16.mxu0 %v2381_v8  ;;  %v2396_v23 = vld [vmem:[#allocation5 + $0x90] sm:$0xff]   ;;  %v2397_v24 = vld [vmem:[#allocation5 + $0x48] sm:$0xff]   ;;  %v2401_v28 = vld [vmem:[#allocation5 + $0x40] sm:$0xff]  }
  0x26   :  { %2178 = vmatprep.subr.bf16.mxu1 %v2382_v9  ;;  %v2398_v25 = vld [vmem:[#allocation5 + $0xc8] sm:$0xff]   ;;  %v2402_v29 = vld [vmem:[#allocation5 + $0xc0] sm:$0xff]   ;;  %v2411_v36 = vld [vmem:[#allocation5 + $0x178] sm:$0xff]  }
  0x27   :  { %v2399_v26 = vld [vmem:[#allocation5 + $0x8] sm:$0xff]   ;;  %v2403_v30 = vld [vmem:[#allocation5] sm:$0xff]   ;;  %v2412_v37 = vld [vmem:[#allocation5 + $0x1f8] sm:$0xff]  }
  0x28   :  { %2115 = vmatpush3.bf16.msra.mxu0 %v2383_v10  ;;  %v2400_v27 = vld [vmem:[#allocation5 + $0x88] sm:$0xff]   ;;  %v2404_v31 = vld [vmem:[#allocation5 + $0x80] sm:$0xff]   ;;  %v2413_v38 = vld [vmem:[#allocation5 + $0x138] sm:$0xff]  }
  0x29   :  { %2179 = vmatpush3.bf16.msra.mxu1 %v2384_v11  ;;  %2116 = vmatprep.subr.bf16.mxu0 %v2385_v12  ;;  %v2405_v32 = vld [vmem:[#allocation2] ss:$8 sps:$4 sm:$0xff]   ;;  %v2407_v33 = vld [vmem:[#allocation2 + $0x4] ss:$8 sps:$4 sm:$0xff]   ;;  %v2414_v39 = vld [vmem:[#allocation5 + $0x1b8] sm:$0xff]  }
  0x2a   :  { %2180 = vmatprep.subr.bf16.mxu1 %v2386_v13  ;;  %v2408_v34 = vld [vmem:[#allocation2 + $0x80] ss:$8 sps:$4 sm:$0xff]   ;;  %v2410_v35 = vld [vmem:[#allocation2 + $0x84] ss:$8 sps:$4 sm:$0xff]   ;;  %441 = vmatprep.mubr.bf16.mxu0 %v2407_v33  ;;  %v2415_v40 = vld [vmem:[#allocation2 + $0x14] ss:$8 sps:$4 sm:$0xff]  }
  0x2b   :  { %714 = vmatprep.mubr.bf16.mxu1 %v2410_v35  ;;  %v2417_v41 = vld [vmem:[#allocation2 + $0x94] ss:$8 sps:$4 sm:$0xff]   ;;  %v2419_v42 = vld [vmem:[#allocation2 + $0x10] ss:$8 sps:$4 sm:$0xff]   ;;  %v2425_v48 = vld [vmem:[#allocation2 + $0x24] ss:$8 sps:$4 sm:$0xff]  }
  0x2c   :  { %2117 = vmatpush3.bf16.msra.mxu0 %v2387_v14  ;;  %v2420_v43 = vld [vmem:[#allocation2 + $0x90] ss:$8 sps:$4 sm:$0xff]   ;;  %v2427_v49 = vld [vmem:[#allocation2 + $0xa4] ss:$8 sps:$4 sm:$0xff]   ;;  %v2429_v50 = vld [vmem:[#allocation2 + $0x20] ss:$8 sps:$4 sm:$0xff]  }
  0x2d   :  { %2181 = vmatpush3.bf16.msra.mxu1 %v2388_v15  ;;  %2118 = vmatprep.subr.bf16.mxu0 %v2389_v16  ;;  %v2421_v44 = vld [vmem:[#allocation5 + $0x170] sm:$0xff]   ;;  %v2430_v51 = vld [vmem:[#allocation2 + $0xa0] ss:$8 sps:$4 sm:$0xff]   ;;  %v2445_v0 = vld [vmem:[#allocation2 + $0x44] ss:$8 sps:$4 sm:$0xff]  }
  0x2e   :  { %2182 = vmatprep.subr.bf16.mxu1 %v2390_v17  ;;  %v2422_v45 = vld [vmem:[#allocation5 + $0x1f0] sm:$0xff]   ;;  %v2431_v52 = vld [vmem:[#allocation5 + $0x168] sm:$0xff]   ;;  %v2441_v60 = vld [vmem:[#allocation5 + $0x160] sm:$0xff]  }
  0x2f   :  { %v2423_v46 = vld [vmem:[#allocation5 + $0x130] sm:$0xff]   ;;  %v2432_v53 = vld [vmem:[#allocation5 + $0x1e8] sm:$0xff]   ;;  %v2442_v61 = vld [vmem:[#allocation5 + $0x1e0] sm:$0xff]  }
  0x30   :  { %2119 = vmatpush3.bf16.msra.mxu0 %v2391_v18  ;;  %v2424_v47 = vld [vmem:[#allocation5 + $0x1b0] sm:$0xff]   ;;  %v2433_v54 = vld [vmem:[#allocation5 + $0x128] sm:$0xff]   ;;  %v2443_v62 = vld [vmem:[#allocation5 + $0x120] sm:$0xff]  }
  0x31   :  { %2183 = vmatpush3.bf16.msra.mxu1 %v2392_v19  ;;  %2120 = vmatprep.subr.bf16.mxu0 %v2393_v20  ;;  %v2434_v55 = vld [vmem:[#allocation5 + $0x1a8] sm:$0xff]   ;;  %v2435_v56 = vld [vmem:[#allocation2 + $0x34] ss:$8 sps:$4 sm:$0xff]   ;;  %v2439_v58 = vld [vmem:[#allocation2 + $0x30] ss:$8 sps:$4 sm:$0xff]  }
  0x32   :  { %2184 = vmatprep.subr.bf16.mxu1 %v2394_v21  ;;  %v2437_v57 = vld [vmem:[#allocation2 + $0xb4] ss:$8 sps:$4 sm:$0xff]   ;;  %v2440_v59 = vld [vmem:[#allocation2 + $0xb0] ss:$8 sps:$4 sm:$0xff]   ;;  %v2444_v63 = vld [vmem:[#allocation5 + $0x1a0] sm:$0xff]  }
  0x33   :  { %v2447_v1 = vld [vmem:[#allocation2 + $0xc4] ss:$8 sps:$4 sm:$0xff]   ;;  %v2449_v2 = vld [vmem:[#allocation2 + $0x40] ss:$8 sps:$4 sm:$0xff]   ;;  %v2451_v3 = vld [vmem:[#allocation5 + $0x158] sm:$0xff]  }
  0x34   :  { %2121 = vmatpush3.bf16.msra.mxu0 %v2395_v22  ;;  %v2450_v4 = vld [vmem:[#allocation2 + $0xc0] ss:$8 sps:$4 sm:$0xff]   ;;  %v2452_v5 = vld [vmem:[#allocation5 + $0x1d8] sm:$0xff]   ;;  %v2461_v10 = vld [vmem:[#allocation5 + $0x150] sm:$0xff]  }
  0x35   :  { %2185 = vmatpush3.bf16.msra.mxu1 %v2396_v23  ;;  %2122 = vmatprep.subr.bf16.mxu0 %v2397_v24  ;;  %v2453_v6 = vld [vmem:[#allocation5 + $0x118] sm:$0xff]   ;;  %v2462_v11 = vld [vmem:[#allocation5 + $0x1d0] sm:$0xff]   ;;  %v2465_v16 = vld [vmem:[#allocation2 + $0x64] ss:$8 sps:$4 sm:$0xff]  }
  0x36   :  { %2186 = vmatprep.subr.bf16.mxu1 %v2398_v25  ;;  %v2454_v7 = vld [vmem:[#allocation5 + $0x198] sm:$0xff]   ;;  %v2463_v13 = vld [vmem:[#allocation5 + $0x110] sm:$0xff]   ;;  %v2467_v17 = vld [vmem:[#allocation2 + $0xe4] ss:$8 sps:$4 sm:$0xff]  }
  0x37   :  { %v2455_v8 = vld [vmem:[#allocation2 + $0x54] ss:$8 sps:$4 sm:$0xff]   ;;  %v2459_v12 = vld [vmem:[#allocation2 + $0x50] ss:$8 sps:$4 sm:$0xff]   ;;  %v2471_v18 = vld [vmem:[#allocation5 + $0x148] sm:$0xff]  }
  0x38   :  { %2123 = vmatpush3.bf16.msra.mxu0 %v2399_v26  ;;  %v2457_v9 = vld [vmem:[#allocation2 + $0xd4] ss:$8 sps:$4 sm:$0xff]   ;;  %v2460_v15 = vld [vmem:[#allocation2 + $0xd0] ss:$8 sps:$4 sm:$0xff]   ;;  %v2472_v19 = vld [vmem:[#allocation5 + $0x1c8] sm:$0xff]  }
  0x39   :  { %2187 = vmatpush3.bf16.msra.mxu1 %v2400_v27  ;;  %2124 = vmatprep.subr.bf16.mxu0 %v2401_v28  ;;  %v2464_v14 = vld [vmem:[#allocation5 + $0x190] sm:$0xff]   ;;  %v2473_v20 = vld [vmem:[#allocation5 + $0x108] sm:$0xff]   ;;  %v2481_v26 = vld [vmem:[#allocation5 + $0x140] sm:$0xff]  }
  0x3a   :  { %2188 = vmatprep.subr.bf16.mxu1 %v2402_v29  ;;  %v2474_v21 = vld [vmem:[#allocation5 + $0x188] sm:$0xff]   ;;  %v2475_v24 = vld [vmem:[#allocation2 + $0x74] ss:$8 sps:$4 sm:$0xff]   ;;  %v2482_v27 = vld [vmem:[#allocation5 + $0x1c0] sm:$0xff]  }
  0x3b   :  { %v2469_v22 = vld [vmem:[#allocation2 + $0x60] ss:$8 sps:$4 sm:$0xff]   ;;  %v2477_v25 = vld [vmem:[#allocation2 + $0xf4] ss:$8 sps:$4 sm:$0xff]   ;;  %v2490_v33 = vld [vmem:[#allocation2 + $0x184] ss:$8 sps:$4 sm:$0xff]  }
  0x3c   :  { %2125 = vmatpush3.bf16.msra.mxu0 %v2403_v30  ;;  %v2470_v23 = vld [vmem:[#allocation2 + $0xe0] ss:$8 sps:$4 sm:$0xff]   ;;  %v2479_v30 = vld [vmem:[#allocation2 + $0x70] ss:$8 sps:$4 sm:$0xff]  }
  0x3d   :  { %2189 = vmatpush3.bf16.msra.mxu1 %v2404_v31  ;;  %2238 = vmatprep.subr.bf16.mxu0 %v2411_v36  ;;  %v2483_v28 = vld [vmem:[#allocation5 + $0x100] sm:$0xff]   ;;  %v2480_v31 = vld [vmem:[#allocation2 + $0xf0] ss:$8 sps:$4 sm:$0xff]   ;;  %v2491_v36 = vld [vmem:[#allocation2 + $0x114] ss:$8 sps:$4 sm:$0xff]  }
  0x3e   :  { %2302 = vmatprep.subr.bf16.mxu1 %v2412_v37  ;;  %v2484_v29 = vld [vmem:[#allocation5 + $0x180] sm:$0xff]   ;;  %v2493_v37 = vld [vmem:[#allocation2 + $0x194] ss:$8 sps:$4 sm:$0xff]  }
  0x3f   :  { %442 = vmatmul.mubr.bf16.vlgmr.msra.gmra.mxu0 %v2405_v32  ;;  %v2487_v32 = vld [vmem:[#allocation2 + $0x104] ss:$8 sps:$4 sm:$0xff]   ;;  %v2488_v35 = vld [vmem:[#allocation2 + $0x180] ss:$8 sps:$4 sm:$0xff]  }
  0x40   :  { %715 = vmatmul.mubr.bf16.vlgmr.msra.gmra.mxu1 %v2408_v34  ;;  %2239 = vmatpush3.bf16.msra.mxu0 %v2413_v38  ;;  %v2485_v34 = vld [vmem:[#allocation2 + $0x100] ss:$8 sps:$4 sm:$0xff]   ;;  %v2495_v38 = vld [vmem:[#allocation2 + $0x110] ss:$8 sps:$4 sm:$0xff]  }
  0x41   :  { %2303 = vmatpush3.bf16.msra.mxu1 %v2414_v39  ;;  %449 = vmatprep.mubr.bf16.mxu0 %v2415_v40  ;;  %v2496_v39 = vld [vmem:[#allocation2 + $0x190] ss:$8 sps:$4 sm:$0xff]   ;;  %v2497_v40 = vld [vmem:[#allocation2 + $0x124] ss:$8 sps:$4 sm:$0xff]  }
  0x42   :  { %722 = vmatprep.mubr.bf16.mxu1 %v2417_v41  ;;  %2240 = vmatprep.subr.bf16.mxu0 %v2421_v44  ;;  %v2499_v41 = vld [vmem:[#allocation2 + $0x1a4] ss:$8 sps:$4 sm:$0xff]   ;;  %v2503_v44 = vld [vmem:[#allocation2 + $0x134] ss:$8 sps:$4 sm:$0xff]  }
  0x43   :  { %2304 = vmatprep.subr.bf16.mxu1 %v2422_v45  ;;  %v2505_v45 = vld [vmem:[#allocation2 + $0x1b4] ss:$8 sps:$4 sm:$0xff]  }
  0x44   :  { %2241 = vmatpush3.bf16.msra.mxu0 %v2423_v46  ;;  %v2507_v46 = vld [vmem:[#allocation2 + $0x130] ss:$8 sps:$4 sm:$0xff]  }
  0x45   :  { %2305 = vmatpush3.bf16.msra.mxu1 %v2424_v47  ;;  %2242 = vmatprep.subr.bf16.mxu0 %v2431_v52  ;;  %v2508_v47 = vld [vmem:[#allocation2 + $0x1b0] ss:$8 sps:$4 sm:$0xff]   ;;  %v2515_v52 = vld [vmem:[#allocation2 + $0x154] ss:$8 sps:$4 sm:$0xff]  }
  0x46   :  { %2306 = vmatprep.subr.bf16.mxu1 %v2432_v53  ;;  %v2517_v53 = vld [vmem:[#allocation2 + $0x1d4] ss:$8 sps:$4 sm:$0xff]  }
  0x47   :  { %450 = vmatmul.mubr.bf16.gmra.mxu0 %v2419_v42  ;;  %v2501_v42 = vld [vmem:[#allocation2 + $0x120] ss:$8 sps:$4 sm:$0xff]  }
  0x48   :  { %723 = vmatmul.mubr.bf16.gmra.mxu1 %v2420_v43  ;;  %457 = vmatprep.mubr.bf16.mxu0 %v2425_v48  ;;  %v2502_v43 = vld [vmem:[#allocation2 + $0x1a0] ss:$8 sps:$4 sm:$0xff]   ;;  %v2509_v48 = vld [vmem:[#allocation2 + $0x144] ss:$8 sps:$4 sm:$0xff]  }
  0x49   :  { %730 = vmatprep.mubr.bf16.mxu1 %v2427_v49  ;;  %2243 = vmatpush3.bf16.msra.mxu0 %v2433_v54  ;;  %v2511_v49 = vld [vmem:[#allocation2 + $0x1c4] ss:$8 sps:$4 sm:$0xff]   ;;  %v2519_v54 = vld [vmem:[#allocation2 + $0x150] ss:$8 sps:$4 sm:$0xff]  }
  0x4a   :  { %2307 = vmatpush3.bf16.msra.mxu1 %v2434_v55  ;;  %2244 = vmatprep.subr.bf16.mxu0 %v2441_v60  ;;  %v2520_v55 = vld [vmem:[#allocation2 + $0x1d0] ss:$8 sps:$4 sm:$0xff]   ;;  %v2527_v60 = vld [vmem:[#allocation2 + $0x174] ss:$8 sps:$4 sm:$0xff]  }
  0x4b   :  { %2308 = vmatprep.subr.bf16.mxu1 %v2442_v61  ;;  %v2529_v61 = vld [vmem:[#allocation2 + $0x1f4] ss:$8 sps:$4 sm:$0xff]  }
  0x4d   :  { %2245 = vmatpush3.bf16.msra.mxu0 %v2443_v62  ;;  %v2531_v62 = vld [vmem:[#allocation2 + $0x170] ss:$8 sps:$4 sm:$0xff]  }
  0x4e   :  { %2309 = vmatpush3.bf16.msra.mxu1 %v2444_v63  ;;  %2246 = vmatprep.subr.bf16.mxu0 %v2451_v3  ;;  %v2532_v63 = vld [vmem:[#allocation2 + $0x1f0] ss:$8 sps:$4 sm:$0xff]  }
  0x4f   :  { %458 = vmatmul.mubr.bf16.gmra.mxu0 %v2429_v50  ;;  %2310 = vmatprep.subr.bf16.mxu1 %v2452_v5  ;;  %v2513_v50 = vld [vmem:[#allocation2 + $0x140] ss:$8 sps:$4 sm:$0xff]  }
  0x50   :  { %731 = vmatmul.mubr.bf16.gmra.mxu1 %v2430_v51  ;;  %465 = vmatprep.mubr.bf16.mxu0 %v2435_v56  ;;  %v2514_v51 = vld [vmem:[#allocation2 + $0x1c0] ss:$8 sps:$4 sm:$0xff]   ;;  %v2521_v56 = vld [vmem:[#allocation2 + $0x164] ss:$8 sps:$4 sm:$0xff]  }
  0x51   :  { %738 = vmatprep.mubr.bf16.mxu1 %v2437_v57  ;;  %2247 = vmatpush3.bf16.msra.mxu0 %v2453_v6  ;;  %v2523_v57 = vld [vmem:[#allocation2 + $0x1e4] ss:$8 sps:$4 sm:$0xff]  }
  0x52   :  { %2311 = vmatpush3.bf16.msra.mxu1 %v2454_v7  ;;  %2248 = vmatprep.subr.bf16.mxu0 %v2461_v10 }
  0x53   :  { %2312 = vmatprep.subr.bf16.mxu1 %v2462_v11 }
  0x55   :  { %2249 = vmatpush3.bf16.msra.mxu0 %v2463_v13 }
  0x56   :  { %2313 = vmatpush3.bf16.msra.mxu1 %v2464_v14  ;;  %2250 = vmatprep.subr.bf16.mxu0 %v2471_v18 }
  0x57   :  { %466 = vmatmul.mubr.bf16.gmra.mxu0 %v2439_v58  ;;  %2314 = vmatprep.subr.bf16.mxu1 %v2472_v19  ;;  %v2525_v58 = vld [vmem:[#allocation2 + $0x160] ss:$8 sps:$4 sm:$0xff]  }
  0x58   :  { %739 = vmatmul.mubr.bf16.gmra.mxu1 %v2440_v59  ;;  %473 = vmatprep.mubr.bf16.mxu0 %v2445_v0  ;;  %v2526_v59 = vld [vmem:[#allocation2 + $0x1e0] ss:$8 sps:$4 sm:$0xff]  }
  0x59   :  { %746 = vmatprep.mubr.bf16.mxu1 %v2447_v1  ;;  %2251 = vmatpush3.bf16.msra.mxu0 %v2473_v20 }
  0x5a   :  { %2315 = vmatpush3.bf16.msra.mxu1 %v2474_v21  ;;  %2252 = vmatprep.subr.bf16.mxu0 %v2481_v26 }
  0x5b   :  { %2316 = vmatprep.subr.bf16.mxu1 %v2482_v27 }
  0x5d   :  { %2253 = vmatpush3.bf16.msra.mxu0 %v2483_v28 }
  0x5e   :  { %2317 = vmatpush3.bf16.msra.mxu1 %v2484_v29 }
  0x5f   :  { %474 = vmatmul.mubr.bf16.gmra.mxu0 %v2449_v2 }
  0x60   :  { %747 = vmatmul.mubr.bf16.gmra.mxu1 %v2450_v4  ;;  %481 = vmatprep.mubr.bf16.mxu0 %v2455_v8 }
  0x61   :  { %754 = vmatprep.mubr.bf16.mxu1 %v2457_v9 }
  0x67   :  { %482 = vmatmul.mubr.bf16.gmra.mxu0 %v2459_v12 }
  0x68   :  { %755 = vmatmul.mubr.bf16.gmra.mxu1 %v2460_v15  ;;  %489 = vmatprep.mubr.bf16.mxu0 %v2465_v16 }
  0x69   :  { %762 = vmatprep.mubr.bf16.mxu1 %v2467_v17 }
  0x6f   :  { %490 = vmatmul.mubr.bf16.gmra.mxu0 %v2469_v22 }
  0x70   :  { %763 = vmatmul.mubr.bf16.gmra.mxu1 %v2470_v23  ;;  %497 = vmatprep.mubr.bf16.mxu0 %v2475_v24 }
  0x71   :  { %770 = vmatprep.mubr.bf16.mxu1 %v2477_v25 }
  0x77   :  { %498 = vmatmul.mubr.bf16.gmra.mxu0 %v2479_v30 }
  0x78   :  { %771 = vmatmul.mubr.bf16.gmra.mxu1 %v2480_v31  ;;  %987 = vmatprep.mubr.bf16.mxu0 %v2487_v32 }
  0x79   :  { %1260 = vmatprep.mubr.bf16.mxu1 %v2490_v33 }
  0x7f   :  { %988 = vmatmul.mubr.bf16.vlgmr.msra.gmra.mxu0 %v2485_v34 }
  0x80   :  { %1261 = vmatmul.mubr.bf16.vlgmr.msra.gmra.mxu1 %v2488_v35  ;;  %995 = vmatprep.mubr.bf16.mxu0 %v2491_v36 }
  0x81   :  { %1268 = vmatprep.mubr.bf16.mxu1 %v2493_v37 }
  0x87   :  { %996 = vmatmul.mubr.bf16.gmra.mxu0 %v2495_v38 }
  0x88   :  { %1269 = vmatmul.mubr.bf16.gmra.mxu1 %v2496_v39  ;;  %1003 = vmatprep.mubr.bf16.mxu0 %v2497_v40 }
  0x89   :  { %1276 = vmatprep.mubr.bf16.mxu1 %v2499_v41 }
  0x8f   :  { %1004 = vmatmul.mubr.bf16.gmra.mxu0 %v2501_v42 }
  0x90   :  { %1277 = vmatmul.mubr.bf16.gmra.mxu1 %v2502_v43  ;;  %1011 = vmatprep.mubr.bf16.mxu0 %v2503_v44 }
  0x91   :  { %1284 = vmatprep.mubr.bf16.mxu1 %v2505_v45 }
  0x97   :  { %1012 = vmatmul.mubr.bf16.gmra.mxu0 %v2507_v46 }
  0x98   :  { %1285 = vmatmul.mubr.bf16.gmra.mxu1 %v2508_v47  ;;  %1019 = vmatprep.mubr.bf16.mxu0 %v2509_v48 }
  0x99   :  { %1292 = vmatprep.mubr.bf16.mxu1 %v2511_v49 }
  0x9f   :  { %1020 = vmatmul.mubr.bf16.gmra.mxu0 %v2513_v50 }
  0xa0   :  { %1293 = vmatmul.mubr.bf16.gmra.mxu1 %v2514_v51  ;;  %1027 = vmatprep.mubr.bf16.mxu0 %v2515_v52 }
  0xa1   :  { %1300 = vmatprep.mubr.bf16.mxu1 %v2517_v53 }
  0xa7   :  { %1028 = vmatmul.mubr.bf16.gmra.mxu0 %v2519_v54 }
  0xa8   :  { %1301 = vmatmul.mubr.bf16.gmra.mxu1 %v2520_v55  ;;  %1035 = vmatprep.mubr.bf16.mxu0 %v2521_v56 }
  0xa9   :  { %1308 = vmatprep.mubr.bf16.mxu1 %v2523_v57 }
  0xaf   :  { %1036 = vmatmul.mubr.bf16.gmra.mxu0 %v2525_v58 }
  0xb0   :  { %1309 = vmatmul.mubr.bf16.gmra.mxu1 %v2526_v59  ;;  %1043 = vmatprep.mubr.bf16.mxu0 %v2527_v60 }
  0xb1   :  { %1316 = vmatprep.mubr.bf16.mxu1 %v2529_v61 }
  0xb7   :  { %1044 = vmatmul.mubr.bf16.gmra.mxu0 %v2531_v62 }
  0xb8   :  { %1317 = vmatmul.mubr.bf16.gmra.mxu1 %v2532_v63 }
  0xff   :  { %v2126_v0 = vpop.f32.mrf.mxu0 }
 0x100   :  { %v2190_v1 = vpop.f32.mrf.mxu1 }
 0x101   :  { %v2127_v2 = vpop.f32.mrf.mxu0 }
 0x102   :  { %v2191_v3 = vpop.f32.mrf.mxu1  ;;  %v2128_v7 = vadd.f32 %v2127_v2, %v2126_v0 }
 0x103   :  { %v2129_v4 = vpop.f32.mrf.mxu0  ;;  %v2192_v10 = vadd.f32 %v2191_v3, %v2190_v1 }
 0x104   :  { %v2193_v5 = vpop.f32.mrf.mxu1 }
 0x105   :  { %v2130_v6 = vpop.f32.mrf.mxu0 }
 0x106   :  { %v2131_v8 = vadd.f32 %v2130_v6, %v2129_v4  ;;  %v2194_v9 = vpop.f32.mrf.mxu1 }
 0x107   :  { %v2195_v11 = vadd.f32 %v2194_v9, %v2193_v5  ;;  %v2132_v12 = vpop.f32.mrf.mxu0 }
 0x108   :  { %v1922_v13 = vpack.c.bf16 %v2131_v8, %v2128_v7  ;;  %v2196_v14 = vpop.f32.mrf.mxu1 }
 0x109   :  { %v1962_v15 = vpack.c.bf16 %v2195_v11, %v2192_v10  ;;  %v2133_v16 = vpop.f32.mrf.mxu0 }
 0x10a   :  { %1923 = vst [vmem:[#allocation7] sm:$0xff] %v1922_v13   ;;  %v2197_v17 = vpop.f32.mrf.mxu1  ;;  %v2134_v21 = vadd.f32 %v2133_v16, %v2132_v12 }
 0x10b   :  { %2086 = vst [vmem:[#allocation7 + $0x40] sm:$0xff] %v1962_v15   ;;  %v2135_v18 = vpop.f32.mrf.mxu0  ;;  %v2198_v24 = vadd.f32 %v2197_v17, %v2196_v14 }
 0x10c   :  { %v2199_v19 = vpop.f32.mrf.mxu1 }
 0x10d   :  { %v2136_v20 = vpop.f32.mrf.mxu0 }
 0x10e   :  { %v2137_v22 = vadd.f32 %v2136_v20, %v2135_v18  ;;  %v2200_v23 = vpop.f32.mrf.mxu1 }
 0x10f   :  { %v2201_v25 = vadd.f32 %v2200_v23, %v2199_v19  ;;  %v2138_v26 = vpop.f32.mrf.mxu0 }
 0x110   :  { %v1927_v27 = vpack.c.bf16 %v2137_v22, %v2134_v21  ;;  %v2202_v28 = vpop.f32.mrf.mxu1 }
 0x111   :  { %v1967_v29 = vpack.c.bf16 %v2201_v25, %v2198_v24  ;;  %v2139_v30 = vpop.f32.mrf.mxu0 }
 0x112   :  { %2079 = vst [vmem:[#allocation7 + $0x8] sm:$0xff] %v1927_v27   ;;  %v2203_v31 = vpop.f32.mrf.mxu1  ;;  %v2140_v35 = vadd.f32 %v2139_v30, %v2138_v26 }
 0x113   :  { %2087 = vst [vmem:[#allocation7 + $0x48] sm:$0xff] %v1967_v29   ;;  %v2141_v32 = vpop.f32.mrf.mxu0  ;;  %v2204_v38 = vadd.f32 %v2203_v31, %v2202_v28 }
 0x114   :  { %v2205_v33 = vpop.f32.mrf.mxu1 }
 0x115   :  { %v2142_v34 = vpop.f32.mrf.mxu0 }
 0x116   :  { %v2143_v36 = vadd.f32 %v2142_v34, %v2141_v32  ;;  %v2206_v37 = vpop.f32.mrf.mxu1 }
 0x117   :  { %v2207_v39 = vadd.f32 %v2206_v37, %v2205_v33  ;;  %v2144_v40 = vpop.f32.mrf.mxu0 }
 0x118   :  { %v1932_v41 = vpack.c.bf16 %v2143_v36, %v2140_v35  ;;  %v2208_v42 = vpop.f32.mrf.mxu1 }
 0x119   :  { %v1972_v43 = vpack.c.bf16 %v2207_v39, %v2204_v38  ;;  %v2145_v44 = vpop.f32.mrf.mxu0 }
 0x11a   :  { %2080 = vst [vmem:[#allocation7 + $0x10] sm:$0xff] %v1932_v41   ;;  %v2209_v45 = vpop.f32.mrf.mxu1  ;;  %v2146_v49 = vadd.f32 %v2145_v44, %v2144_v40 }
 0x11b   :  { %2088 = vst [vmem:[#allocation7 + $0x50] sm:$0xff] %v1972_v43   ;;  %v2147_v46 = vpop.f32.mrf.mxu0  ;;  %v2210_v52 = vadd.f32 %v2209_v45, %v2208_v42 }
 0x11c   :  { %v2211_v47 = vpop.f32.mrf.mxu1 }
 0x11d   :  { %v2148_v48 = vpop.f32.mrf.mxu0 }
 0x11e   :  { %v2149_v50 = vadd.f32 %v2148_v48, %v2147_v46  ;;  %v2212_v51 = vpop.f32.mrf.mxu1 }
 0x11f   :  { %v2213_v53 = vadd.f32 %v2212_v51, %v2211_v47  ;;  %v2150_v54 = vpop.f32.mrf.mxu0 }
 0x120   :  { %v1937_v55 = vpack.c.bf16 %v2149_v50, %v2146_v49  ;;  %v2214_v56 = vpop.f32.mrf.mxu1 }
 0x121   :  { %v1977_v57 = vpack.c.bf16 %v2213_v53, %v2210_v52  ;;  %v2151_v58 = vpop.f32.mrf.mxu0 }
 0x122   :  { %2081 = vst [vmem:[#allocation7 + $0x18] sm:$0xff] %v1937_v55   ;;  %v2215_v59 = vpop.f32.mrf.mxu1  ;;  %v2152_v63 = vadd.f32 %v2151_v58, %v2150_v54 }
 0x123   :  { %2089 = vst [vmem:[#allocation7 + $0x58] sm:$0xff] %v1977_v57   ;;  %v2153_v60 = vpop.f32.mrf.mxu0  ;;  %v2216_v2 = vadd.f32 %v2215_v59, %v2214_v56 }
 0x124   :  { %v2217_v61 = vpop.f32.mrf.mxu1 }
 0x125   :  { %v2154_v62 = vpop.f32.mrf.mxu0 }
 0x126   :  { %v2155_v0 = vadd.f32 %v2154_v62, %v2153_v60  ;;  %v2218_v1 = vpop.f32.mrf.mxu1 }
 0x127   :  { %v2219_v3 = vadd.f32 %v2218_v1, %v2217_v61  ;;  %v2156_v4 = vpop.f32.mrf.mxu0 }
 0x128   :  { %v1942_v5 = vpack.c.bf16 %v2155_v0, %v2152_v63  ;;  %v2220_v6 = vpop.f32.mrf.mxu1 }
 0x129   :  { %v1982_v7 = vpack.c.bf16 %v2219_v3, %v2216_v2  ;;  %v2157_v8 = vpop.f32.mrf.mxu0 }
 0x12a   :  { %2082 = vst [vmem:[#allocation7 + $0x20] sm:$0xff] %v1942_v5   ;;  %v2221_v9 = vpop.f32.mrf.mxu1  ;;  %v2158_v13 = vadd.f32 %v2157_v8, %v2156_v4 }
 0x12b   :  { %2090 = vst [vmem:[#allocation7 + $0x60] sm:$0xff] %v1982_v7   ;;  %v2159_v10 = vpop.f32.mrf.mxu0  ;;  %v2222_v16 = vadd.f32 %v2221_v9, %v2220_v6 }
 0x12c   :  { %v2223_v11 = vpop.f32.mrf.mxu1 }
 0x12d   :  { %v2160_v12 = vpop.f32.mrf.mxu0 }
 0x12e   :  { %v2161_v14 = vadd.f32 %v2160_v12, %v2159_v10  ;;  %v2224_v15 = vpop.f32.mrf.mxu1 }
 0x12f   :  { %v2225_v17 = vadd.f32 %v2224_v15, %v2223_v11  ;;  %v2162_v18 = vpop.f32.mrf.mxu0 }
 0x130   :  { %v1947_v19 = vpack.c.bf16 %v2161_v14, %v2158_v13  ;;  %v2226_v20 = vpop.f32.mrf.mxu1 }
 0x131   :  { %v1987_v21 = vpack.c.bf16 %v2225_v17, %v2222_v16  ;;  %v2163_v22 = vpop.f32.mrf.mxu0 }
 0x132   :  { %2083 = vst [vmem:[#allocation7 + $0x28] sm:$0xff] %v1947_v19   ;;  %v2227_v23 = vpop.f32.mrf.mxu1  ;;  %v2164_v27 = vadd.f32 %v2163_v22, %v2162_v18 }
 0x133   :  { %2091 = vst [vmem:[#allocation7 + $0x68] sm:$0xff] %v1987_v21   ;;  %v2165_v24 = vpop.f32.mrf.mxu0  ;;  %v2228_v30 = vadd.f32 %v2227_v23, %v2226_v20 }
 0x134   :  { %v2229_v25 = vpop.f32.mrf.mxu1 }
 0x135   :  { %v2166_v26 = vpop.f32.mrf.mxu0 }
 0x136   :  { %v2167_v28 = vadd.f32 %v2166_v26, %v2165_v24  ;;  %v2230_v29 = vpop.f32.mrf.mxu1 }
 0x137   :  { %v2231_v31 = vadd.f32 %v2230_v29, %v2229_v25  ;;  %v2168_v32 = vpop.f32.mrf.mxu0 }
 0x138   :  { %v1952_v33 = vpack.c.bf16 %v2167_v28, %v2164_v27  ;;  %v2232_v34 = vpop.f32.mrf.mxu1 }
 0x139   :  { %v1992_v35 = vpack.c.bf16 %v2231_v31, %v2228_v30  ;;  %v2169_v36 = vpop.f32.mrf.mxu0 }
 0x13a   :  { %2084 = vst [vmem:[#allocation7 + $0x30] sm:$0xff] %v1952_v33   ;;  %v2233_v37 = vpop.f32.mrf.mxu1  ;;  %v2170_v41 = vadd.f32 %v2169_v36, %v2168_v32 }
 0x13b   :  { %2092 = vst [vmem:[#allocation7 + $0x70] sm:$0xff] %v1992_v35   ;;  %v2171_v38 = vpop.f32.mrf.mxu0  ;;  %v2234_v44 = vadd.f32 %v2233_v37, %v2232_v34 }
 0x13c   :  { %v2235_v39 = vpop.f32.mrf.mxu1 }
 0x13d   :  { %v2172_v40 = vpop.f32.mrf.mxu0 }
 0x13e   :  { %v2173_v42 = vadd.f32 %v2172_v40, %v2171_v38  ;;  %v2236_v43 = vpop.f32.mrf.mxu1 }
 0x13f   :  { %v2237_v45 = vadd.f32 %v2236_v43, %v2235_v39  ;;  %v2254_v46 = vpop.f32.mrf.mxu0 }
 0x140   :  { %v1957_v47 = vpack.c.bf16 %v2173_v42, %v2170_v41  ;;  %v2318_v48 = vpop.f32.mrf.mxu1 }
 0x141   :  { %v1997_v49 = vpack.c.bf16 %v2237_v45, %v2234_v44  ;;  %v2255_v50 = vpop.f32.mrf.mxu0 }
 0x142   :  { %2085 = vst [vmem:[#allocation7 + $0x38] sm:$0xff] %v1957_v47   ;;  %v2319_v51 = vpop.f32.mrf.mxu1  ;;  %v2256_v55 = vadd.f32 %v2255_v50, %v2254_v46 }
 0x143   :  { %2093 = vst [vmem:[#allocation7 + $0x78] sm:$0xff] %v1997_v49   ;;  %v2257_v52 = vpop.f32.mrf.mxu0  ;;  %v2320_v58 = vadd.f32 %v2319_v51, %v2318_v48 }
 0x144   :  { %v2321_v53 = vpop.f32.mrf.mxu1 }
 0x145   :  { %v2258_v54 = vpop.f32.mrf.mxu0 }
 0x146   :  { %v2259_v56 = vadd.f32 %v2258_v54, %v2257_v52  ;;  %v2322_v57 = vpop.f32.mrf.mxu1 }
 0x147   :  { %v2323_v59 = vadd.f32 %v2322_v57, %v2321_v53  ;;  %v2260_v60 = vpop.f32.mrf.mxu0 }
 0x148   :  { %v2002_v61 = vpack.c.bf16 %v2259_v56, %v2256_v55  ;;  %v2324_v62 = vpop.f32.mrf.mxu1 }
 0x149   :  { %v2042_v63 = vpack.c.bf16 %v2323_v59, %v2320_v58  ;;  %v2261_v0 = vpop.f32.mrf.mxu0 }
 0x14a   :  { %2094 = vst [vmem:[#allocation7 + $0x80] sm:$0xff] %v2002_v61   ;;  %v2325_v1 = vpop.f32.mrf.mxu1  ;;  %v2262_v5 = vadd.f32 %v2261_v0, %v2260_v60 }
 0x14b   :  { %2102 = vst [vmem:[#allocation7 + $0xc0] sm:$0xff] %v2042_v63   ;;  %v2263_v2 = vpop.f32.mrf.mxu0  ;;  %v2326_v8 = vadd.f32 %v2325_v1, %v2324_v62 }
 0x14c   :  { %v2327_v3 = vpop.f32.mrf.mxu1 }
 0x14d   :  { %v2264_v4 = vpop.f32.mrf.mxu0 }
 0x14e   :  { %v2265_v6 = vadd.f32 %v2264_v4, %v2263_v2  ;;  %v2328_v7 = vpop.f32.mrf.mxu1 }
 0x14f   :  { %v2329_v9 = vadd.f32 %v2328_v7, %v2327_v3  ;;  %v2266_v10 = vpop.f32.mrf.mxu0 }
 0x150   :  { %v2007_v11 = vpack.c.bf16 %v2265_v6, %v2262_v5  ;;  %v2330_v12 = vpop.f32.mrf.mxu1 }
 0x151   :  { %v2047_v13 = vpack.c.bf16 %v2329_v9, %v2326_v8  ;;  %v2267_v14 = vpop.f32.mrf.mxu0 }
 0x152   :  { %2095 = vst [vmem:[#allocation7 + $0x88] sm:$0xff] %v2007_v11   ;;  %v2331_v15 = vpop.f32.mrf.mxu1  ;;  %v2268_v19 = vadd.f32 %v2267_v14, %v2266_v10 }
 0x153   :  { %2103 = vst [vmem:[#allocation7 + $0xc8] sm:$0xff] %v2047_v13   ;;  %v2269_v16 = vpop.f32.mrf.mxu0  ;;  %v2332_v22 = vadd.f32 %v2331_v15, %v2330_v12 }
 0x154   :  { %v2333_v17 = vpop.f32.mrf.mxu1 }
 0x155   :  { %v2270_v18 = vpop.f32.mrf.mxu0 }
 0x156   :  { %v2271_v20 = vadd.f32 %v2270_v18, %v2269_v16  ;;  %v2334_v21 = vpop.f32.mrf.mxu1 }
 0x157   :  { %v2335_v23 = vadd.f32 %v2334_v21, %v2333_v17  ;;  %v2272_v24 = vpop.f32.mrf.mxu0 }
 0x158   :  { %v2012_v25 = vpack.c.bf16 %v2271_v20, %v2268_v19  ;;  %v2336_v26 = vpop.f32.mrf.mxu1 }
 0x159   :  { %v2052_v27 = vpack.c.bf16 %v2335_v23, %v2332_v22  ;;  %v2273_v28 = vpop.f32.mrf.mxu0 }
 0x15a   :  { %2096 = vst [vmem:[#allocation7 + $0x90] sm:$0xff] %v2012_v25   ;;  %v2337_v29 = vpop.f32.mrf.mxu1  ;;  %v2274_v33 = vadd.f32 %v2273_v28, %v2272_v24 }
 0x15b   :  { %2104 = vst [vmem:[#allocation7 + $0xd0] sm:$0xff] %v2052_v27   ;;  %v2275_v30 = vpop.f32.mrf.mxu0  ;;  %v2338_v36 = vadd.f32 %v2337_v29, %v2336_v26 }
 0x15c   :  { %v2339_v31 = vpop.f32.mrf.mxu1 }
 0x15d   :  { %v2276_v32 = vpop.f32.mrf.mxu0 }
 0x15e   :  { %v2277_v34 = vadd.f32 %v2276_v32, %v2275_v30  ;;  %v2340_v35 = vpop.f32.mrf.mxu1 }
 0x15f   :  { %v2341_v37 = vadd.f32 %v2340_v35, %v2339_v31  ;;  %v2278_v38 = vpop.f32.mrf.mxu0 }
 0x160   :  { %v2017_v39 = vpack.c.bf16 %v2277_v34, %v2274_v33  ;;  %v2342_v40 = vpop.f32.mrf.mxu1 }
 0x161   :  { %v2057_v41 = vpack.c.bf16 %v2341_v37, %v2338_v36  ;;  %v2279_v42 = vpop.f32.mrf.mxu0 }
 0x162   :  { %2097 = vst [vmem:[#allocation7 + $0x98] sm:$0xff] %v2017_v39   ;;  %v2343_v43 = vpop.f32.mrf.mxu1  ;;  %v2280_v47 = vadd.f32 %v2279_v42, %v2278_v38 }
 0x163   :  { %2105 = vst [vmem:[#allocation7 + $0xd8] sm:$0xff] %v2057_v41   ;;  %v2281_v44 = vpop.f32.mrf.mxu0  ;;  %v2344_v50 = vadd.f32 %v2343_v43, %v2342_v40 }
 0x164   :  { %v2345_v45 = vpop.f32.mrf.mxu1 }
 0x165   :  { %v2282_v46 = vpop.f32.mrf.mxu0 }
 0x166   :  { %v2283_v48 = vadd.f32 %v2282_v46, %v2281_v44  ;;  %v2346_v49 = vpop.f32.mrf.mxu1 }
 0x167   :  { %v2347_v51 = vadd.f32 %v2346_v49, %v2345_v45  ;;  %v2284_v52 = vpop.f32.mrf.mxu0 }
 0x168   :  { %v2022_v53 = vpack.c.bf16 %v2283_v48, %v2280_v47  ;;  %v2348_v54 = vpop.f32.mrf.mxu1 }
 0x169   :  { %v2062_v55 = vpack.c.bf16 %v2347_v51, %v2344_v50  ;;  %v2285_v56 = vpop.f32.mrf.mxu0 }
 0x16a   :  { %2098 = vst [vmem:[#allocation7 + $0xa0] sm:$0xff] %v2022_v53   ;;  %v2349_v57 = vpop.f32.mrf.mxu1  ;;  %v2286_v61 = vadd.f32 %v2285_v56, %v2284_v52 }
 0x16b   :  { %2106 = vst [vmem:[#allocation7 + $0xe0] sm:$0xff] %v2062_v55   ;;  %v2287_v58 = vpop.f32.mrf.mxu0  ;;  %v2350_v0 = vadd.f32 %v2349_v57, %v2348_v54 }
 0x16c   :  { %v2351_v59 = vpop.f32.mrf.mxu1 }
 0x16d   :  { %v2288_v60 = vpop.f32.mrf.mxu0 }
 0x16e   :  { %v2289_v62 = vadd.f32 %v2288_v60, %v2287_v58  ;;  %v2352_v63 = vpop.f32.mrf.mxu1 }
 0x16f   :  { %v2353_v1 = vadd.f32 %v2352_v63, %v2351_v59  ;;  %v2290_v2 = vpop.f32.mrf.mxu0 }
 0x170   :  { %v2027_v3 = vpack.c.bf16 %v2289_v62, %v2286_v61  ;;  %v2354_v4 = vpop.f32.mrf.mxu1 }
 0x171   :  { %v2067_v5 = vpack.c.bf16 %v2353_v1, %v2350_v0  ;;  %v2291_v6 = vpop.f32.mrf.mxu0 }
 0x172   :  { %2099 = vst [vmem:[#allocation7 + $0xa8] sm:$0xff] %v2027_v3   ;;  %v2355_v7 = vpop.f32.mrf.mxu1  ;;  %v2292_v11 = vadd.f32 %v2291_v6, %v2290_v2 }
 0x173   :  { %2107 = vst [vmem:[#allocation7 + $0xe8] sm:$0xff] %v2067_v5   ;;  %v2293_v8 = vpop.f32.mrf.mxu0  ;;  %v2356_v14 = vadd.f32 %v2355_v7, %v2354_v4 }
 0x174   :  { %v2357_v9 = vpop.f32.mrf.mxu1 }
 0x175   :  { %v2294_v10 = vpop.f32.mrf.mxu0 }
 0x176   :  { %v2295_v12 = vadd.f32 %v2294_v10, %v2293_v8  ;;  %v2358_v13 = vpop.f32.mrf.mxu1 }
 0x177   :  { %v2359_v15 = vadd.f32 %v2358_v13, %v2357_v9  ;;  %v2296_v16 = vpop.f32.mrf.mxu0 }
 0x178   :  { %v2032_v17 = vpack.c.bf16 %v2295_v12, %v2292_v11  ;;  %v2360_v18 = vpop.f32.mrf.mxu1 }
 0x179   :  { %v2072_v19 = vpack.c.bf16 %v2359_v15, %v2356_v14  ;;  %v2297_v20 = vpop.f32.mrf.mxu0 }
 0x17a   :  { %2100 = vst [vmem:[#allocation7 + $0xb0] sm:$0xff] %v2032_v17   ;;  %v2361_v21 = vpop.f32.mrf.mxu1  ;;  %v2298_v25 = vadd.f32 %v2297_v20, %v2296_v16 }
 0x17b   :  { %2108 = vst [vmem:[#allocation7 + $0xf0] sm:$0xff] %v2072_v19   ;;  %v2299_v22 = vpop.f32.mrf.mxu0  ;;  %v2362_v28 = vadd.f32 %v2361_v21, %v2360_v18 }
 0x17c   :  { %v2363_v23 = vpop.f32.mrf.mxu1 }
 0x17d   :  { %v2300_v24 = vpop.f32.mrf.mxu0 }
 0x17e   :  { %v2301_v26 = vadd.f32 %v2300_v24, %v2299_v22  ;;  %v2364_v27 = vpop.f32.mrf.mxu1 }
 0x17f   :  { %v2365_v29 = vadd.f32 %v2364_v27, %v2363_v23 }
 0x180   :  { %v2037_v30 = vpack.c.bf16 %v2301_v26, %v2298_v25 }
 0x181   :  { %v2077_v31 = vpack.c.bf16 %v2365_v29, %v2362_v28 }
 0x182   :  { %2101 = vst [vmem:[#allocation7 + $0xb8] sm:$0xff] %v2037_v30  }
 0x183   :  { %2109 = vst [vmem:[#allocation7 + $0xf8] sm:$0xff] %v2077_v31  }
 0x184   :  { %2584 = shalt.err (!%p2581_p0)
}
 0x185   :  { %1656 = dma.vmem_to_hbm [thread:$0]  %s1651_s1, 4096, %s2638_s2, [#allocation4], %s2603_s19, %s2603_s19, %s2604_s20  }
 0x186   :  { %2597 = dma.done.wait [#allocation4], 4096  }
 0x187   :  { %2598 = vsyncadd [#allocation4], 4294963200 }
 0x188   :  { %1660 = vsyncpa [#allocation3], 1 }
 0x189   :  { %1661 = vsyncpa [#allocation6], 1 }
 0x18a   :  { %1662 = vsyncpa [#allocation4], 1 }

</bundles_post_ra>
